<compile_context>
chip_gen: v6e
topology: v6e:2x2x1
jax: 0.10.0
libtpu: 0.0.40
codegen_flags: <defaults>
</compile_context>

<pallas_src>
import functools

import jax
import jax.numpy as jnp
from jax.experimental import pallas as pl
from jax.experimental.pallas import tpu as pltpu


def _round_up(x, m):
    return (x + m - 1) // m * m


def _pick_tk(d_pad):
    """Largest K tile (multiple of 128, <= 2048) that divides d_pad exactly."""
    for t in (2048, 1024, 512, 256, 128):
        if d_pad % t == 0:
            return t
    return d_pad  # unreachable: d_pad is always a multiple of 128


def _fused_linear_bce_kernel(x_ref, w_ref, b_ref, y_ref,
                             logits_ref, lsum_ref,
                             *, tm, tk, w_resident, b_valid, n_valid):
    """Grid = (m_blocks, k_blocks).

    CORRECTNESS INVARIANT: K (the reduction) must remain the TRAILING
    "arbitrary" grid axis and the logits / lsum index maps must ignore k —
    both outputs are only finalized at k == nk - 1 and rely on their blocks
    staying resident across the K axis.

    x_ref      : (tm, tk)          activations (native dtype, cast in-kernel)
    w_ref      : (D_pad, N_pad) if w_resident else (tk, N_pad)   (bf16/f32)
    b_ref      : (1, N_pad)  f32
    y_ref      : (tm, N_pad) f32 targets (zero padded)
    logits_ref : (tm, N_pad) f32 output; doubles as the K accumulator
    lsum_ref   : (1, 1)      f32 SMEM per-M-block BCE partial sum
    """
    # Grid queries stay at the top level of the kernel body (NOT inside
    # pl.when closures) — required for both Mosaic and the interpret path.
    i = pl.program_id(0)
    k = pl.program_id(1)
    nk = pl.num_programs(1)

    @pl.when(k == 0)
    def _init():
        # Bias-initialize the resident output block; K steps accumulate on top
        # (no separate VMEM scratch accumulator).
        logits_ref[...] = jnp.broadcast_to(b_ref[...], logits_ref.shape)

    if w_resident:
        # W was DMA'd once (constant index map); slice the current K panel.
        w_tile = w_ref[pl.ds(k * tk, tk), :]
    else:
        w_tile = w_ref[...]

    # MXU matmul: bf16 operands (cast here, not in HBM), f32 accumulation
    # directly into the output block.
    logits_ref[...] += jnp.dot(x_ref[...].astype(w_tile.dtype), w_tile,
                               preferred_element_type=jnp.float32)

    @pl.when(k == nk - 1)
    def _epilogue():
        z = logits_ref[...]                                  # (tm, N_pad) f32
        y = y_ref[...]
        # Numerically stable BCE-with-logits:
        #   max(z, 0) - z*y + log1p(exp(-|z|))
        per = jnp.maximum(z, 0.0) - z * y + jnp.log1p(jnp.exp(-jnp.abs(z)))

        # Mask padded rows / columns so the mean stays exact after padding.
        rows = i * tm + jax.lax.broadcasted_iota(jnp.int32, per.shape, 0)
        cols = jax.lax.broadcasted_iota(jnp.int32, per.shape, 1)
        mask = (rows < b_valid) & (cols < n_valid)
        lsum_ref[0, 0] = jnp.sum(jnp.where(mask, per, 0.0))


def fused_linear_bce(x_flat, w_p, b_p, targets, *, n_valid,
                     w_resident_max_bytes=8 * 1024 * 1024):
    """logits = x_flat @ W + b ; loss = mean(BCEWithLogits(logits, targets)).

    w_p : (D_pad, N_pad) padded (bf16/f32) weights, b_p : (1, N_pad) f32;
    both are prepared once (see FusedLinearBCELossWrapper.__init__).
    """
    B, D = x_flat.shape
    D_pad, N_pad = w_p.shape
    N = n_valid
    assert targets.shape == (B, N)
    assert D_pad == _round_up(D, 128) and N_pad % 128 == 0

    # Row tiling: a single full-extent block for small B (no row padding and
    # no trailing row slice); otherwise 8-aligned tiles of 256 rows
    # (256 fills the v6e/v7x 256x256 MXU; M stays "parallel" for megacore).
    if B <= 256:
        B_pad, tm = B, B
    else:
        tm = 256
        B_pad = _round_up(B, tm)

    tk = _pick_tk(D_pad)
    m_blocks = B_pad // tm
    k_blocks = D_pad // tk

    # x is fed in its native dtype and only materialized/padded if misaligned.
    if (B_pad, D_pad) != (B, D):
        x_in = jnp.zeros((B_pad, D_pad), x_flat.dtype).at[:B, :D].set(x_flat)
    else:
        x_in = x_flat

    # Targets are logits-sized (small); pad to the lane-dense slab.
    if (B_pad, N_pad) != (B, N):
        y_p = jnp.zeros((B_pad, N_pad), jnp.float32).at[:B, :N].set(
            targets.astype(jnp.float32))
    else:
        y_p = targets.astype(jnp.float32)

    # Hold W resident in VMEM (single DMA, sliced per K step) when it fits;
    # otherwise stream (tk, N_pad) tiles.
    w_resident = (D_pad * N_pad * w_p.dtype.itemsize) <= w_resident_max_bytes
    if w_resident:
        w_spec = pl.BlockSpec((D_pad, N_pad), lambda i, k: (0, 0))
    else:
        w_spec = pl.BlockSpec((tk, N_pad), lambda i, k: (k, 0))

    kernel = functools.partial(_fused_linear_bce_kernel,
                               tm=tm, tk=tk, w_resident=w_resident,
                               b_valid=B, n_valid=N)

    logits_pad, loss_parts = pl.pallas_call(
        kernel,
        out_shape=(
            jax.ShapeDtypeStruct((B_pad, N_pad), jnp.float32),
            jax.ShapeDtypeStruct((m_blocks, 1), jnp.float32),
        ),
        grid_spec=pltpu.PrefetchScalarGridSpec(
            num_scalar_prefetch=0,
            grid=(m_blocks, k_blocks),      # K must stay the trailing axis
            in_specs=[
                pl.BlockSpec((tm, tk), lambda i, k: (i, k)),       # x
                w_spec,                                            # W
                pl.BlockSpec((1, N_pad), lambda i, k: (0, 0)),     # bias
                pl.BlockSpec((tm, N_pad), lambda i, k: (i, 0)),    # targets
            ],
            out_specs=[
                pl.BlockSpec((tm, N_pad), lambda i, k: (i, 0)),    # logits
                pl.BlockSpec((1, 1), lambda i, k: (i, 0),
                             memory_space=pltpu.SMEM),             # loss part
            ],
        ),
        compiler_params=pltpu.CompilerParams(
            dimension_semantics=("parallel", "arbitrary"),
            vmem_limit_bytes=32 * 1024 * 1024,   # safe on v5e/v6e and v7x
        ),
    )(x_in, w_p, b_p, y_p)

    logits = logits_pad
    if (B_pad, N_pad) != (B, N):
        logits = logits_pad[:B, :N]
    loss = jnp.sum(loss_parts) * jnp.float32(1.0 / (B * N))
    return logits, loss


class FusedLinearBCELossWrapper:
    """JAX/Pallas equivalent of
       LossWrapper(model=Linear(D, N), input_key="image",
                   losses={"my_loss": LossModule(output_key="logits",
                                                 target_key="targets",
                                                 loss_fn=BCEWithLogitsLoss())})

    forward(**inputs) -> {"logits": ..., "my_loss": ...}
    The model's matmul and the BCE loss are fused into a single Pallas kernel.
    """

    def __init__(self, w, b, input_key="image", target_key="targets",
                 loss_name="my_loss", use_bf16=True):
        D, N = w.shape
        D_pad = _round_up(D, 128)
        N_pad = _round_up(max(N, 128), 128)
        op_dtype = jnp.bfloat16 if use_bf16 else jnp.float32
        # One-time parameter pad + cast (kept off the per-forward path).
        self.w_p = jnp.zeros((D_pad, N_pad), op_dtype).at[:D, :N].set(
            w.astype(op_dtype))
        self.b_p = jnp.zeros((1, N_pad), jnp.float32).at[0, :N].set(
            b.astype(jnp.float32))
        self.n_classes = N
        self.input_key = input_key
        self.target_key = target_key
        self.loss_names = [loss_name]

    def __call__(self, **inputs):
        img = inputs[self.input_key]
        x_flat = img.reshape(img.shape[0], -1)         # NCHW -> (B, C*H*W)
        logits, loss = fused_linear_bce(
            x_flat, self.w_p, self.b_p, inputs[self.target_key],
            n_valid=self.n_classes)
        output = {"logits": logits}
        for key in self.loss_names:
            output[key] = loss
        return output


if __name__ == "__main__":
    key = jax.random.PRNGKey(0)
    k_img, k_tgt, k_w, k_b = jax.random.split(key, 4)

    B, C, H, W = 2, 4, 16, 16            # NCHW, as in PyTorch
    N_CLASSES = 8
    D = C * H * W

    image = jax.random.normal(k_img, (B, C, H, W), dtype=jnp.float32)
    targets = (jax.random.uniform(k_tgt, (B, N_CLASSES)) > 0.5).astype(jnp.float32)

    # Deterministic parameter init for the synthetic linear model.
    w = jax.random.normal(k_w, (D, N_CLASSES), dtype=jnp.float32) * 0.02
    b = jax.random.normal(k_b, (N_CLASSES,), dtype=jnp.float32) * 0.01

    wrapper = FusedLinearBCELossWrapper(w, b)
    out = wrapper(image=image, targets=targets)
    jax.block_until_ready(out["logits"])
    jax.block_until_ready(out["my_loss"])

    # Pure-JAX reference, matching the kernel's bf16-operand / f32-accumulate dot.
    x_flat = image.reshape(B, -1)
    ref_logits = jnp.dot(x_flat.astype(jnp.bfloat16).astype(jnp.float32),
                         w.astype(jnp.bfloat16).astype(jnp.float32),
                         precision=jax.lax.Precision.HIGHEST) + b
    z = ref_logits
    ref_loss = jnp.mean(jnp.maximum(z, 0.0) - z * targets +
                        jnp.log1p(jnp.exp(-jnp.abs(z))))

    assert out["logits"].shape == (B, N_CLASSES)
    assert jnp.allclose(out["logits"], ref_logits, atol=1e-4, rtol=1e-4)
    assert jnp.allclose(out["my_loss"], ref_loss, atol=1e-4, rtol=1e-4)

    print("KERNEL_OK")
</pallas_src>

<mosaic_0001>
module attributes {stable_mosaic.version = 11 : i64} {
  func.func @_fused_linear_bce_kernel(%arg0: i32, %arg1: i32, %arg2: memref<2x1024xf32, #tpu.memory_space<vmem>>, %arg3: memref<1024x128xbf16, #tpu.memory_space<vmem>>, %arg4: memref<1x128xf32, #tpu.memory_space<vmem>>, %arg5: memref<2x128xf32, #tpu.memory_space<vmem>>, %arg6: memref<2x128xf32, #tpu.memory_space<vmem>>, %arg7: memref<1x1xf32, #tpu.memory_space<smem>>) attributes {dimension_semantics = [#tpu.dimension_semantics<parallel>, #tpu.dimension_semantics<arbitrary>], iteration_bounds = array<i64: 1, 1>, scalar_prefetch = 0 : i64, scratch_operands = 0 : i64, tpu.core_type = #tpu.core_type<tc>, window_params = [{transform_indices = @transform_0, window_bounds = array<i64: 2, 1024>}, {pipeline_mode = #tpu.pipeline_mode<synchronous>, transform_indices = @transform_1, window_bounds = array<i64: 1024, 128>}, {pipeline_mode = #tpu.pipeline_mode<synchronous>, transform_indices = @transform_2, window_bounds = array<i64: 1, 128>}, {transform_indices = @transform_3, window_bounds = array<i64: 2, 128>}, {transform_indices = @transform_4, window_bounds = array<i64: 2, 128>}, {transform_indices = @transform_5, window_bounds = array<i64: 1, 1>}]} {
    %c0_i32 = arith.constant 0 : i32
    %0 = arith.cmpi eq, %arg1, %c0_i32 : i32
    %1 = arith.extui %0 : i1 to i32
    %c0_i32_0 = arith.constant 0 : i32
    %2 = arith.cmpi ne, %1, %c0_i32_0 : i32
    scf.if %2 {
      %c0_9 = arith.constant 0 : index
      %c0_10 = arith.constant 0 : index
      %15 = vector.load %arg4[%c0_9, %c0_10] : memref<1x128xf32, #tpu.memory_space<vmem>>, vector<1x128xf32>
      %16 = vector.shape_cast %15 : vector<1x128xf32> to vector<1x128xf32>
      %17 = vector.broadcast %16 : vector<1x128xf32> to vector<2x128xf32>
      %c0_11 = arith.constant 0 : index
      %c0_12 = arith.constant 0 : index
      %18 = vector.load %arg6[%c0_11, %c0_12] : memref<2x128xf32, #tpu.memory_space<vmem>>, vector<2x128xf32>
      tpu.vector_store %arg6[%c0_11, %c0_12], %17 {strides = array<i32>} : memref<2x128xf32, #tpu.memory_space<vmem>>, vector<2x128xf32>,
    } else {
    }
    %c1024_i32 = arith.constant 1024 : i32
    %3 = arith.muli %arg1, %c1024_i32 : i32
    %4 = arith.index_cast %3 : i32 to index
    %c0 = arith.constant 0 : index
    %5 = vector.load %arg3[%4, %c0] : memref<1024x128xbf16, #tpu.memory_space<vmem>>, vector<1024x128xbf16>
    %c0_1 = arith.constant 0 : index
    %c0_2 = arith.constant 0 : index
    %6 = vector.load %arg6[%c0_1, %c0_2] : memref<2x128xf32, #tpu.memory_space<vmem>>, vector<2x128xf32>
    %c0_3 = arith.constant 0 : index
    %c0_4 = arith.constant 0 : index
    %7 = vector.load %arg2[%c0_3, %c0_4] : memref<2x1024xf32, #tpu.memory_space<vmem>>, vector<2x1024xf32>
    %8 = arith.truncf %7 : vector<2x1024xf32> to vector<2x1024xbf16>
    %cst = arith.constant dense<0.000000e+00> : vector<2x128xf32>
    %9 = tpu.matmul %8, %5, %cst {dimension_numbers = #tpu.dot_dimension_numbers<[1], [0], [0], [1], [0, 0, 1, 1], [], []>} : vector<2x1024xbf16>, vector<1024x128xbf16>, vector<2x128xf32> -> vector<2x128xf32>
    %10 = arith.addf %6, %9 : vector<2x128xf32>
    %c0_5 = arith.constant 0 : index
    %c0_6 = arith.constant 0 : index
    %11 = vector.load %arg6[%c0_5, %c0_6] : memref<2x128xf32, #tpu.memory_space<vmem>>, vector<2x128xf32>
    tpu.vector_store %arg6[%c0_5, %c0_6], %10 {strides = array<i32>} : memref<2x128xf32, #tpu.memory_space<vmem>>, vector<2x128xf32>,
    %c0_i32_7 = arith.constant 0 : i32
    %12 = arith.cmpi eq, %arg1, %c0_i32_7 : i32
    %13 = arith.extui %12 : i1 to i32
    %c0_i32_8 = arith.constant 0 : i32
    %14 = arith.cmpi ne, %13, %c0_i32_8 : i32
    scf.if %14 {
      %c0_9 = arith.constant 0 : index
      %c0_10 = arith.constant 0 : index
      %15 = vector.load %arg6[%c0_9, %c0_10] : memref<2x128xf32, #tpu.memory_space<vmem>>, vector<2x128xf32>
      %c0_11 = arith.constant 0 : index
      %c0_12 = arith.constant 0 : index
      %16 = vector.load %arg5[%c0_11, %c0_12] : memref<2x128xf32, #tpu.memory_space<vmem>>, vector<2x128xf32>
      %cst_13 = arith.constant 0.000000e+00 : f32
      %17 = vector.broadcast %cst_13 : f32 to vector<2x128xf32>
      %18 = arith.maximumf %15, %17 : vector<2x128xf32>
      %19 = arith.mulf %15, %16 : vector<2x128xf32>
      %20 = arith.subf %18, %19 : vector<2x128xf32>
      %21 = math.absf %15 : vector<2x128xf32>
      %cst_14 = arith.constant 0.000000e+00 : f32
      %22 = vector.broadcast %cst_14 : f32 to vector<2x128xf32>
      %23 = arith.subf %22, %21 : vector<2x128xf32>
      %24 = math.exp %23 : vector<2x128xf32>
      %25 = math.log1p %24 : vector<2x128xf32>
      %26 = arith.addf %20, %25 : vector<2x128xf32>
      %c2_i32 = arith.constant 2 : i32
      %27 = arith.muli %arg0, %c2_i32 : i32
      %28 = tpu.iota {dimensions = array<i32: 0>} : vector<2x128xi32>
      %29 = vector.broadcast %27 : i32 to vector<2x128xi32>
      %30 = arith.addi %29, %28 : vector<2x128xi32>
      %31 = tpu.iota {dimensions = array<i32: 1>} : vector<2x128xi32>
      %c2_i32_15 = arith.constant 2 : i32
      %32 = vector.broadcast %c2_i32_15 : i32 to vector<2x128xi32>
      %33 = arith.cmpi slt, %30, %32 : vector<2x128xi32>
      %c8_i32 = arith.constant 8 : i32
      %34 = vector.broadcast %c8_i32 : i32 to vector<2x128xi32>
      %35 = arith.cmpi slt, %31, %34 : vector<2x128xi32>
      %36 = arith.andi %33, %35 : vector<2x128xi1>
      %cst_16 = arith.constant 0.000000e+00 : f32
      %37 = vector.broadcast %cst_16 : f32 to vector<2x128xf32>
      %38 = arith.select %36, %26, %37 : vector<2x128xi1>, vector<2x128xf32>
      %39 = vector.shape_cast %38 : vector<2x128xf32> to vector<1x2x128xf32>
      %cst_17 = arith.constant dense<0.000000e+00> : vector<1xf32>
      %40 = vector.multi_reduction <add>, %39, %cst_17 [1, 2] : vector<1x2x128xf32> to vector<1xf32>
      %41 = vector.shape_cast %40 : vector<1xf32> to vector<1x1x1xf32>
      %42 = vector.extract %41[0, 0, 0] : f32 from vector<1x1x1xf32>
      %c0_18 = arith.constant 0 : index
      %c0_19 = arith.constant 0 : index
      %43 = memref.load %arg7[%c0_18, %c0_19] : memref<1x1xf32, #tpu.memory_space<smem>>
      memref.store %42, %arg7[%c0_18, %c0_19] : memref<1x1xf32, #tpu.memory_space<smem>>
    } else {
    }
    return
  }
  func.func @transform_0(%arg0: i32, %arg1: i32) -> (i32, i32) {
    %c0_i32 = arith.constant 0 : i32
    return %arg0, %arg1 : i32, i32
  }
  func.func @transform_1(%arg0: i32, %arg1: i32) -> (i32, i32) {
    %c0_i32 = arith.constant 0 : i32
    %c0_i32_0 = arith.constant 0 : i32
    %c0_i32_1 = arith.constant 0 : i32
    return %c0_i32, %c0_i32_0 : i32, i32
  }
  func.func @transform_2(%arg0: i32, %arg1: i32) -> (i32, i32) {
    %c0_i32 = arith.constant 0 : i32
    %c0_i32_0 = arith.constant 0 : i32
    %c0_i32_1 = arith.constant 0 : i32
    return %c0_i32, %c0_i32_0 : i32, i32
  }
  func.func @transform_3(%arg0: i32, %arg1: i32) -> (i32, i32) {
    %c0_i32 = arith.constant 0 : i32
    %c0_i32_0 = arith.constant 0 : i32
    return %arg0, %c0_i32 : i32, i32
  }
  func.func @transform_4(%arg0: i32, %arg1: i32) -> (i32, i32) {
    %c0_i32 = arith.constant 0 : i32
    %c0_i32_0 = arith.constant 0 : i32
    return %arg0, %c0_i32 : i32, i32
  }
  func.func @transform_5(%arg0: i32, %arg1: i32) -> (i32, i32) {
    %c0_i32 = arith.constant 0 : i32
    %c0_i32_0 = arith.constant 0 : i32
    return %arg0, %c0_i32 : i32, i32
  }
}

</mosaic_0001>

<bundles_post_ra>
// kernel: tpu_custom_call.1
= control target key start
LH: loop header
LB: loop body
LE: loop exit
PB: predicated region body
PF: predicated region fallthrough
CT: control target
= control target key end

     0   :  { %11 = vsyncpa [#allocation3], 0  ;;  %s1246_s0 = inlined_call_operand.hbm [shape: f32[2,1024], index: 0, kind: input, shape index: {}]   ;;  %s1247_s1 = inlined_call_operand.hbm [shape: bf16[1024,128], index: 1, kind: input, shape index: {}]   ;;  %s1248_s2 = inlined_call_operand.vmem [shape: f32[1,128], index: 2, kind: input, shape index: {}]   ;;  %s1249_s3 = inlined_call_operand.vmem [shape: f32[2,128], index: 3, kind: input, shape index: {}]   ;;  %s1250_s4 = inlined_call_operand.hbm [shape: f32[2,128], index: 4, kind: output, shape index: {0}]   ;;  %s1251_s5 = inlined_call_operand.hbm [shape: f32[1,1], index: 5, kind: output, shape index: {1}]  }
   0x1   :  { %12 = vsyncpa [#allocation7], 0 }
   0x2   :  { %13 = vsyncpa [#allocation4], 0 }
   0x3   :  { %14 = vsyncpa [#allocation5], 0  ;;  %s1179_s18 = smov [#allocation2]   ;;  %s1180_s20 = smov [#allocation6]  }
   0x4   :  { %s21_s19 = sshll.u32 %s1179_s18, 4  ;;  %s30_s21 = sshll.u32 %s1180_s20, 4  ;;  %s22_s19 = int_to_ptr.vmem [resolvable:$true] %s21_s19  ;;  %s31_s21 = int_to_ptr.vmem [resolvable:$true] %s30_s21 }
   0x5   :  { %s1111_s22 = scalar_lea.vmem %s22_s19, 256  ;;  %p1116_p1 = scmp.lt.s32.totalorder %s22_s19, %s22_s19 }
   0x6   :  { %p1112_p0 = scmp.ne.s32.totalorder %s22_s19, %s1111_s22  ;;  %p1117_p2 = scmp.lt.s32.totalorder %s1111_s22, %s1111_s22 }
   0x8   :  { %p1118_p3 = por %p1117_p2, %p1116_p1 }
   0xa   :  { %p1119_p4 = pnand %p1118_p3, %p1112_p0 }
   0xc   :  { %1122 = shalt.err (!%p1119_p4)
}
   0xd   :  { %24 = dma.hbm_to_vmem [thread:$0]  %s1246_s0, 256, %s22_s19, [#allocation3]  }
   0xe   :  { %s1131_s25 = scalar_lea.vmem %s31_s21, 8192  ;;  %p1136_p6 = scmp.lt.s32.totalorder %s31_s21, %s31_s21 }
   0xf   :  { %p1132_p5 = scmp.ne.s32.totalorder %s31_s21, %s1131_s25  ;;  %p1137_p7 = scmp.lt.s32.totalorder %s1131_s25, %s1131_s25 }
  0x11   :  { %p1138_p8 = por %p1137_p7, %p1136_p6 }
  0x13   :  { %p1139_p9 = pnand %p1138_p8, %p1132_p5 }
  0x15   :  { %1142 = shalt.err (!%p1139_p9)
}
  0x16   :  { %s1181_s26 = smov 64   ;;  %s1182_s27 = smov 4  }
  0x17   :  { %36 = dma.hbm_to_vmem [thread:$0]  %s1247_s1, 8192, %s31_s21, [#allocation7], %s1181_s26, %s1181_s26, %s1182_s27  }
  0x18   :  { %1171 = dma.done.wait [#allocation3], 256  }
  0x19   :  { %1172 = vsyncadd [#allocation3], 4294967040 }
  0x1a   :  { %1173 = dma.done.wait [#allocation7], 8192  }
  0x1b   :  { %1174 = vsyncadd [#allocation7], 4294959104  ;;  %v1033_v0 = vld [vmem:[#allocation6 + $0x78] sm:$0xff]   ;;  %v1037_v4 = vld [vmem:[#allocation6 + $0x70] sm:$0xff]   ;;  %v1183_v22 = vmov 1983009808   ;;  %v202_v24 = vlaneseq }
  0x1c   :  { %v1034_v1 = vld [vmem:[#allocation6 + $0xf8] sm:$0xff]   ;;  %936 = vmatprep.subr.bf16.mxu0 %v1033_v0  ;;  %v1038_v5 = vld [vmem:[#allocation6 + $0xf0] sm:$0xff]   ;;  %v1041_v8 = vld [vmem:[#allocation6 + $0x68] sm:$0xff]   ;;  %v200_v23 = vunpack.c.l.s4 %v1183_v22  ;;  %vm827_vm4 = vcmask 1041408  }
  0x1d   :  { %v1035_v2 = vld [vmem:[#allocation6 + $0x38] sm:$0xff]   ;;  %958 = vmatprep.subr.bf16.mxu1 %v1034_v1  ;;  %v1039_v6 = vld [vmem:[#allocation6 + $0x30] sm:$0xff]   ;;  %v1042_v9 = vld [vmem:[#allocation6 + $0xe8] sm:$0xff]   ;;  %v1223_v30 = vshrl.u32 %v202_v24, 7 }
  0x1e   :  { %v1036_v3 = vld [vmem:[#allocation6 + $0xb8] sm:$0xff]   ;;  %937 = vmatpush3.bf16.msra.mxu0 %v1035_v2  ;;  %v1040_v7 = vld [vmem:[#allocation6 + $0xb0] sm:$0xff]   ;;  %v1043_v10 = vld [vmem:[#allocation6 + $0x28] sm:$0xff]   ;;  %v201_v29 = vunpack.c.0.s8 %v200_v23 }
  0x1f   :  { %959 = vmatpush3.bf16.msra.mxu1 %v1036_v3  ;;  %938 = vmatprep.subr.bf16.mxu0 %v1037_v4  ;;  %v1044_v11 = vld [vmem:[#allocation6 + $0xa8] sm:$0xff]   ;;  %v1045_v12 = vld [vmem:[#allocation6 + $0x60] sm:$0xff]   ;;  %v1049_v16 = vld [vmem:[#allocation6 + $0x58] sm:$0xff]   ;;  %vm823_vm0 = vcmp.lt.s32.totalorder %v1223_v30, 2 }
  0x20   :  { %960 = vmatprep.subr.bf16.mxu1 %v1038_v5  ;;  %v1046_v13 = vld [vmem:[#allocation6 + $0xe0] sm:$0xff]   ;;  %v1050_v17 = vld [vmem:[#allocation6 + $0xd8] sm:$0xff]   ;;  %v1053_v20 = vld [vmem:[#allocation6 + $0x50] sm:$0xff]   ;;  %v1226_v35 = vsub.s32 %v201_v29, %v1223_v30 }
  0x21   :  { %v1047_v14 = vld [vmem:[#allocation6 + $0x20] sm:$0xff]   ;;  %v1051_v18 = vld [vmem:[#allocation6 + $0x18] sm:$0xff]   ;;  %v1054_v21 = vld [vmem:[#allocation6 + $0xd0] sm:$0xff]  }
  0x22   :  { %939 = vmatpush3.bf16.msra.mxu0 %v1039_v6  ;;  %v1048_v15 = vld [vmem:[#allocation6 + $0xa0] sm:$0xff]   ;;  %v1052_v19 = vld [vmem:[#allocation6 + $0x98] sm:$0xff]   ;;  %v1055_v25 = vld [vmem:[#allocation6 + $0x10] sm:$0xff]  }
  0x23   :  { %961 = vmatpush3.bf16.msra.mxu1 %v1040_v7  ;;  %940 = vmatprep.subr.bf16.mxu0 %v1041_v8  ;;  %v1056_v26 = vld [vmem:[#allocation6 + $0x90] sm:$0xff]   ;;  %v1057_v27 = vld [vmem:[#allocation6 + $0x48] sm:$0xff]   ;;  %v1061_v33 = vld [vmem:[#allocation6 + $0x40] sm:$0xff]  }
  0x24   :  { %962 = vmatprep.subr.bf16.mxu1 %v1042_v9  ;;  %v1058_v28 = vld [vmem:[#allocation6 + $0xc8] sm:$0xff]   ;;  %v1062_v34 = vld [vmem:[#allocation6 + $0xc0] sm:$0xff]   ;;  %v194_v38 = vld [vmem:[#allocation2] sm:$0xff] }
  0x25   :  { %v1059_v31 = vld [vmem:[#allocation6 + $0x8] sm:$0xff]   ;;  %v1063_v36 = vld [vmem:[#allocation6] sm:$0xff]   ;;  %v205_v39 = vrot.slane %v194_v38, %v1226_v35  ;;  %v198_v40 = vcombine.high %v194_v38, %v194_v38  ;;  %v1066_v41 = vld [vmem:[#allocation6 + $0x178] sm:$0xff]  }
  0x26   :  { %941 = vmatpush3.bf16.msra.mxu0 %v1043_v10  ;;  %v1060_v32 = vld [vmem:[#allocation6 + $0x88] sm:$0xff]   ;;  %v1064_v37 = vld [vmem:[#allocation6 + $0x80] sm:$0xff]   ;;  %v1067_v42 = vld [vmem:[#allocation6 + $0x1f8] sm:$0xff]  }
  0x27   :  { %963 = vmatpush3.bf16.msra.mxu1 %v1044_v11  ;;  %942 = vmatprep.subr.bf16.mxu0 %v1045_v12  ;;  %v213_v43 = vcombine.high %v205_v39, %v205_v39  ;;  %v212_v44 = vrot.slane %v198_v40, %v1226_v35  ;;  %v240_v45 = vpack.c.bf16 %v205_v39, %v205_v39  ;;  %v1068_v48 = vld [vmem:[#allocation6 + $0x138] sm:$0xff]   ;;  %v1070_v50 = vld [vmem:[#allocation6 + $0x170] sm:$0xff]   ;;  %v1074_v55 = vld [vmem:[#allocation6 + $0x168] sm:$0xff]  }
  0x28   :  { %964 = vmatprep.subr.bf16.mxu1 %v1046_v13  ;;  %v1069_v52 = vld [vmem:[#allocation6 + $0x1b8] sm:$0xff]   ;;  %v1071_v53 = vld [vmem:[#allocation6 + $0x1f0] sm:$0xff]   ;;  %v1075_v57 = vld [vmem:[#allocation6 + $0x1e8] sm:$0xff]  }
  0x29   :  { %v241_v46 = vpack.c.bf16 %v213_v43, %v213_v43  ;;  %v214_v47 = vcombine.high %v212_v44, %v212_v44  ;;  %v242_v49 = vpack.c.bf16 %v212_v44, %v212_v44  ;;  %v1072_v54 = vld [vmem:[#allocation6 + $0x130] sm:$0xff]   ;;  %v1076_v58 = vld [vmem:[#allocation6 + $0x128] sm:$0xff]   ;;  %v1078_v59 = vld [vmem:[#allocation6 + $0x160] sm:$0xff]  }
  0x2a   :  { %943 = vmatpush3.bf16.msra.mxu0 %v1047_v14  ;;  %v1073_v56 = vld [vmem:[#allocation6 + $0x1b0] sm:$0xff]   ;;  %v1077_v60 = vld [vmem:[#allocation6 + $0x1a8] sm:$0xff]   ;;  %v1079_v61 = vld [vmem:[#allocation6 + $0x1e0] sm:$0xff]  }
  0x2b   :  { %965 = vmatpush3.bf16.msra.mxu1 %v1048_v15  ;;  %944 = vmatprep.subr.bf16.mxu0 %v1049_v16  ;;  %v243_v51 = vpack.c.bf16 %v214_v47, %v214_v47  ;;  %v1080_v62 = vld [vmem:[#allocation6 + $0x120] sm:$0xff]   ;;  %v1082_v63 = vld [vmem:[#allocation6 + $0x158] sm:$0xff]   ;;  %v1086_v3 = vld [vmem:[#allocation6 + $0x150] sm:$0xff]  }
  0x2c   :  { %966 = vmatprep.subr.bf16.mxu1 %v1050_v17  ;;  %664 = vmatprep.mubr.bf16.mxu0 %v241_v46  ;;  %v1081_v0 = vld [vmem:[#allocation6 + $0x1a0] sm:$0xff]   ;;  %v1083_v1 = vld [vmem:[#allocation6 + $0x1d8] sm:$0xff]   ;;  %v1087_v5 = vld [vmem:[#allocation6 + $0x1d0] sm:$0xff]  }
  0x2d   :  { %704 = vmatprep.mubr.bf16.mxu1 %v243_v51  ;;  %v1084_v2 = vld [vmem:[#allocation6 + $0x118] sm:$0xff]   ;;  %v1088_v6 = vld [vmem:[#allocation6 + $0x110] sm:$0xff]   ;;  %v1090_v7 = vld [vmem:[#allocation6 + $0x148] sm:$0xff]  }
  0x2e   :  { %945 = vmatpush3.bf16.msra.mxu0 %v1051_v18  ;;  %v1085_v4 = vld [vmem:[#allocation6 + $0x198] sm:$0xff]   ;;  %v1089_v8 = vld [vmem:[#allocation6 + $0x190] sm:$0xff]   ;;  %v1091_v9 = vld [vmem:[#allocation6 + $0x1c8] sm:$0xff]  }
  0x2f   :  { %967 = vmatpush3.bf16.msra.mxu1 %v1052_v19  ;;  %946 = vmatprep.subr.bf16.mxu0 %v1053_v20  ;;  %v1092_v10 = vld [vmem:[#allocation6 + $0x108] sm:$0xff]   ;;  %v1094_v11 = vld [vmem:[#allocation6 + $0x140] sm:$0xff]   ;;  %v195_v14 = vld [vmem:[#allocation2 + $0x8] sm:$0xff] }
  0x30   :  { %968 = vmatprep.subr.bf16.mxu1 %v1054_v21  ;;  %v1093_v12 = vld [vmem:[#allocation6 + $0x188] sm:$0xff]   ;;  %v1095_v13 = vld [vmem:[#allocation6 + $0x1c0] sm:$0xff]   ;;  %v222_v16 = vrot.slane %v195_v14, %v1226_v35  ;;  %v215_v17 = vcombine.high %v195_v14, %v195_v14 }
  0x31   :  { %v1096_v15 = vld [vmem:[#allocation6 + $0x100] sm:$0xff]  }
  0x32   :  { %947 = vmatpush3.bf16.msra.mxu0 %v1055_v25  ;;  %v1097_v18 = vld [vmem:[#allocation6 + $0x180] sm:$0xff]   ;;  %v230_v19 = vcombine.high %v222_v16, %v222_v16  ;;  %v229_v20 = vrot.slane %v215_v17, %v1226_v35  ;;  %v244_v21 = vpack.c.bf16 %v222_v16, %v222_v16 }
  0x33   :  { %969 = vmatpush3.bf16.msra.mxu1 %v1056_v26  ;;  %948 = vmatprep.subr.bf16.mxu0 %v1057_v27  ;;  %v871_v27 = vld [vmem:[%s1248_s2] ss:$0 sm:$0xff] }
  0x34   :  { %970 = vmatprep.subr.bf16.mxu1 %v1058_v28  ;;  %v245_v22 = vpack.c.bf16 %v230_v19, %v230_v19  ;;  %v231_v23 = vcombine.high %v229_v20, %v229_v20  ;;  %v246_v25 = vpack.c.bf16 %v229_v20, %v229_v20  ;;  %59 = vst [vmem:[#allocation8] sm:$0x3] %v871_v27 }
  0x36   :  { %949 = vmatpush3.bf16.msra.mxu0 %v1059_v31  ;;  %v247_v26 = vpack.c.bf16 %v231_v23, %v231_v23 }
  0x37   :  { %971 = vmatpush3.bf16.msra.mxu1 %v1060_v32  ;;  %950 = vmatprep.subr.bf16.mxu0 %v1061_v33 }
  0x38   :  { %972 = vmatprep.subr.bf16.mxu1 %v1062_v34 }
  0x3a   :  { %951 = vmatpush3.bf16.msra.mxu0 %v1063_v36 }
  0x3b   :  { %973 = vmatpush3.bf16.msra.mxu1 %v1064_v37  ;;  %980 = vmatprep.subr.bf16.mxu0 %v1066_v41 }
  0x3c   :  { %1002 = vmatprep.subr.bf16.mxu1 %v1067_v42 }
  0x3d   :  { %665 = vmatmul.mubr.bf16.vlgmr.msra.gmra.mxu0 %v240_v45 }
  0x3e   :  { %981 = vmatpush3.bf16.msra.mxu0 %v1068_v48  ;;  %705 = vmatmul.mubr.bf16.vlgmr.msra.gmra.mxu1 %v242_v49  ;;  %v193_v48 = vld [vmem:[#allocation8] sm:$0x3] }
  0x3f   :  { %982 = vmatprep.subr.bf16.mxu0 %v1070_v50  ;;  %1003 = vmatpush3.bf16.msra.mxu1 %v1069_v52 }
  0x40   :  { %1004 = vmatprep.subr.bf16.mxu1 %v1071_v53  ;;  %744 = vmatprep.mubr.bf16.mxu0 %v245_v22 }
  0x41   :  { %784 = vmatprep.mubr.bf16.mxu1 %v247_v26 }
  0x42   :  { %983 = vmatpush3.bf16.msra.mxu0 %v1072_v54 }
  0x43   :  { %984 = vmatprep.subr.bf16.mxu0 %v1074_v55  ;;  %1005 = vmatpush3.bf16.msra.mxu1 %v1073_v56 }
  0x44   :  { %1006 = vmatprep.subr.bf16.mxu1 %v1075_v57 }
  0x46   :  { %985 = vmatpush3.bf16.msra.mxu0 %v1076_v58 }
  0x47   :  { %986 = vmatprep.subr.bf16.mxu0 %v1078_v59  ;;  %1007 = vmatpush3.bf16.msra.mxu1 %v1077_v60 }
  0x48   :  { %1008 = vmatprep.subr.bf16.mxu1 %v1079_v61  ;;  %v798_v61 = vld [vmem:[%s1249_s3] sm:$0x3]  ;;  %s1184_s3 = smov [#allocation8]  }
  0x49   :  { %s846_s6 = sshll.u32 %s1184_s3, 4  ;;  %s847_s6 = int_to_ptr.vmem [resolvable:$true] %s846_s6 }
  0x4a   :  { %987 = vmatpush3.bf16.msra.mxu0 %v1080_v62  ;;  %v822_v62 = vand.u32 127, %v202_v24  ;;  %s1143_s7 = scalar_lea.vmem %s847_s6, 32  ;;  %p1148_p11 = scmp.lt.s32.totalorder %s847_s6, %s847_s6 }
  0x4b   :  { %988 = vmatprep.subr.bf16.mxu0 %v1082_v63  ;;  %1009 = vmatpush3.bf16.msra.mxu1 %v1081_v0  ;;  %p1144_p10 = scmp.ne.s32.totalorder %s847_s6, %s1143_s7  ;;  %p1149_p12 = scmp.lt.s32.totalorder %s1143_s7, %s1143_s7 }
  0x4c   :  { %1010 = vmatprep.subr.bf16.mxu1 %v1083_v1  ;;  %vm824_vm1 = vcmp.lt.s32.totalorder %v822_v62, 8 }
  0x4d   :  { %vm825_vm3 = vmand %vm823_vm0, %vm824_vm1  ;;  %p1150_p13 = por %p1149_p12, %p1148_p11 }
  0x4e   :  { %989 = vmatpush3.bf16.msra.mxu0 %v1084_v2 }
  0x4f   :  { %990 = vmatprep.subr.bf16.mxu0 %v1086_v3  ;;  %1011 = vmatpush3.bf16.msra.mxu1 %v1085_v4  ;;  %p1151_p0 = pnand %p1150_p13, %p1144_p10 }
  0x50   :  { %1012 = vmatprep.subr.bf16.mxu1 %v1087_v5 }
  0x52   :  { %991 = vmatpush3.bf16.msra.mxu0 %v1088_v6 }
  0x53   :  { %992 = vmatprep.subr.bf16.mxu0 %v1090_v7  ;;  %1013 = vmatpush3.bf16.msra.mxu1 %v1089_v8 }
  0x54   :  { %1014 = vmatprep.subr.bf16.mxu1 %v1091_v9 }
  0x56   :  { %993 = vmatpush3.bf16.msra.mxu0 %v1092_v10 }
  0x57   :  { %994 = vmatprep.subr.bf16.mxu0 %v1094_v11  ;;  %1015 = vmatpush3.bf16.msra.mxu1 %v1093_v12 }
  0x58   :  { %1016 = vmatprep.subr.bf16.mxu1 %v1095_v13 }
  0x5a   :  { %995 = vmatpush3.bf16.msra.mxu0 %v1096_v15 }
  0x5b   :  { %1017 = vmatpush3.bf16.msra.mxu1 %v1097_v18 }
  0x5d   :  { %745 = vmatmul.mubr.bf16.vlgmr.msra.gmra.mxu0 %v244_v21 }
  0x5e   :  { %785 = vmatmul.mubr.bf16.vlgmr.msra.gmra.mxu1 %v246_v25 }
  0xfd   :  { %v952_v28 = vpop.f32.mrf.mxu0 }
  0xfe   :  { %v974_v29 = vpop.f32.mrf.mxu1 }
  0xff   :  { %v953_v31 = vpop.f32.mrf.mxu0 }
 0x100   :  { %v975_v32 = vpop.f32.mrf.mxu1  ;;  %v954_v37 = vadd.f32 %v953_v31, %v952_v28 }
 0x101   :  { %v955_v33 = vpop.f32.mrf.mxu0  ;;  %v976_v38 = vadd.f32 %v975_v32, %v974_v29 }
 0x102   :  { %v977_v34 = vpop.f32.mrf.mxu1 }
 0x103   :  { %v956_v35 = vpop.f32.mrf.mxu0  ;;  %v707_v42 = vadd.f32 %v976_v38, %v954_v37 }
 0x104   :  { %v978_v36 = vpop.f32.mrf.mxu1 }
 0x11d   :  { %v996_v39 = vpop.f32.mrf.mxu0 }
 0x11e   :  { %v1018_v40 = vpop.f32.mrf.mxu1 }
 0x11f   :  { %v997_v41 = vpop.f32.mrf.mxu0 }
 0x120   :  { %v998_v43 = vadd.f32 %v997_v41, %v996_v39  ;;  %v1019_v44 = vpop.f32.mrf.mxu1 }
 0x121   :  { %v999_v45 = vpop.f32.mrf.mxu0  ;;  %v1020_v47 = vadd.f32 %v1019_v44, %v1018_v40 }
 0x122   :  { %v747_v46 = vadd.f32 %v998_v43, %v707_v42  ;;  %v1021_v49 = vpop.f32.mrf.mxu1 }
 0x123   :  { %v1000_v50 = vpop.f32.mrf.mxu0 }
 0x124   :  { %v787_v51 = vadd.f32 %v1020_v47, %v747_v46  ;;  %v1022_v52 = vpop.f32.mrf.mxu1 }
 0x126   :  { %v792_v53 = vadd.f32 %v787_v51, %v193_v48 }
 0x128   :  { %793 = vst [vmem:[#allocation8] sm:$0x3] %v792_v53 }
 0x12f   :  { %v797_v54 = vld [vmem:[#allocation8] sm:$0x3] }
 0x130   :  { %v802_v55 = vand.u32 2147483647, %v797_v54  ;;  %v799_v0 = vmax.f32 %v797_v54, 0.0  ;;  %v800_v1 = vmul.f32 %v798_v61, %v797_v54 }
 0x132   :  { %v803_v56 = vsub.f32 0.0, %v802_v55  ;;  %v801_v6 = vsub.f32 %v799_v0, %v800_v1 }
 0x134   :  { %v804_v57 = vmul.f32 1.442695, %v803_v56 }
 0x136   :  { %1099 = vpow2.f32 %v804_v57 }
 0x143   :  { %v1100_v58 = vpop.eup %1099 }
 0x144   :  { %v806_v59 = vadd.f32 1.0, %v1100_v58  ;;  %v809_v60 = vmul.f32 -0.5, %v1100_v58  ;;  %v812_v2 = vand.u32 2147483647, %v1100_v58 }
 0x146   :  { %1101 = vlog2.f32 %v806_v59  ;;  %v810_v63 = vadd.f32 1.0, %v809_v60  ;;  %vm813_vm2 = vcmp.lt.f32.partialorder %v812_v2, 0.0004427343 }
 0x148   :  { %v811_v5 = vmul.f32 %v1100_v58, %v810_v63 }
 0x153   :  { %v1102_v3 = vpop.eup %1101 }
 0x154   :  { %v808_v4 = vmul.f32 0.6931472, %v1102_v3 }
 0x156   :  { %v814_v7 = vsel %vm813_vm2, %v811_v5, %v808_v4 }
 0x157   :  { %v815_v8 = vadd.f32 %v814_v7, %v801_v6 }
 0x159   :  { %v826_v9 = vsel %vm825_vm3, %v815_v8, 0.0 }
 0x15a   :  { %v828_v10 = vsel %vm827_vm4, %v826_v9, 0.0 }
 0x15b   :  { %829 = vadd.xlane.f32.xlu0 %v828_v10 }
 0x15c   :  { %1154 = shalt.err (!%p1151_p0)
}
 0x15d   :  { %849 = dma.vmem_to_hbm [thread:$0]  %s847_s6, 32, %s1250_s4, [#allocation4]  }
 0x15e   :  { %s1185_s11 = smov [#allocation9]  }
 0x1e4   :  { %v830_v24 = vpop.xlane.xlu0 %829 }
 0x1e5   :  { %v831_v30 = vrot.slane %v830_v24, 4 }
 0x1e7   :  { %v832_v11 = vadd.f32 %v831_v30, %v830_v24 }
 0x1e9   :  { %v833_v12 = vrot.slane %v832_v11, 2 }
 0x1eb   :  { %v834_v13 = vadd.f32 %v833_v12, %v832_v11 }
 0x1ed   :  { %v835_v14 = vrot.slane %v834_v13, 1 }
 0x1ef   :  { %v836_v15 = vadd.f32 %v835_v14, %v834_v13 }
 0x1f1   :  { %1024 = vpush %v836_v15 }
 0x222   :  { %s1025_s10 = spop %1024 }
 0x223   :  { %839 = sst [smem:[#allocation9]] %s1025_s10 }
 0x224   :  { %857 = dma.smem_to_hbm %s1185_s11, 16, %s1251_s5, [#allocation5]  }
 0x225   :  { %1175 = dma.done.wait [#allocation4], 32  }
 0x226   :  { %1176 = vsyncadd [#allocation4], 4294967264 }
 0x227   :  { %1177 = dma.done.wait [#allocation5], 16  }
 0x228   :  { %1178 = vsyncadd [#allocation5], 4294967280 }
 0x229   :  { %864 = sfence }
 0x22a   :  { %865 = vsyncpa [#allocation3], 1 }
 0x22b   :  { %866 = vsyncpa [#allocation7], 1 }
 0x22c   :  { %867 = vsyncpa [#allocation4], 1 }
 0x22d   :  { %868 = vsyncpa [#allocation5], 1 }

</bundles_post_ra>
